<compile_context>
chip_gen: v5e
topology: v5e:2x2
jax: 0.10.0
libtpu: 0.0.40
codegen_flags: <defaults>
</compile_context>

<pallas_src>
import functools

import jax
import jax.numpy as jnp
import numpy as np
from jax.experimental import pallas as pl
from jax.experimental.pallas import tpu as pltpu


def _criterion_kernel(boxes_ref, conf_ref, out_ref,
                      acc_bbox, acc_giou, acc_conf,
                      *, n, tile_m, masked):
    """boxes_ref: (8, tile_m, 128) rows 0-3 pred x,y,w,h, rows 4-7 tgt x,y,w,h.
    conf_ref: (tile_m, 128). out_ref: (8, 128). acc_*: (tile_m, 128) f32 scratch."""
    i = pl.program_id(0)

    @pl.when(i == 0)
    def _init():
        acc_bbox[...] = jnp.zeros_like(acc_bbox)
        acc_giou[...] = jnp.zeros_like(acc_giou)
        acc_conf[...] = jnp.zeros_like(acc_conf)

    px = boxes_ref[0]
    py = boxes_ref[1]
    pw = boxes_ref[2]
    ph = boxes_ref[3]
    tx = boxes_ref[4]
    ty = boxes_ref[5]
    tw = boxes_ref[6]
    th = boxes_ref[7]

    # ---- L1 loss on the (cx, cy, w, h) representation (CSE'd deltas) ----
    dx = px - tx
    dy = py - ty
    dw = pw - tw
    dh = ph - th
    l1 = (jnp.abs(dx + 0.5 * dw) + jnp.abs(dy + 0.5 * dh)
          + jnp.abs(dw) + jnp.abs(dh))                      # (tile_m, 128)

    # ---- element-wise GIoU (diagonal of the pairwise GIoU matrix), torchvision math, no eps ----
    px1 = px + pw
    py1 = py + ph
    tx1 = tx + tw
    ty1 = ty + th
    iw = jnp.maximum(jnp.minimum(px1, tx1) - jnp.maximum(px, tx), 0.0)
    ih = jnp.maximum(jnp.minimum(py1, ty1) - jnp.maximum(py, ty), 0.0)
    inter = iw * ih
    union = pw * ph + tw * th - inter
    iou = inter / union                                     # exact divide: matches torchvision
    ew = jnp.maximum(jnp.maximum(px1, tx1) - jnp.minimum(px, tx), 0.0)
    eh = jnp.maximum(jnp.maximum(py1, ty1) - jnp.minimum(py, ty), 0.0)
    enc = ew * eh
    giou = iou - (enc - union) / enc                        # (tile_m, 128)

    one_m_giou = 1.0 - giou
    conf_sq = (conf_ref[...] - giou) ** 2                   # raw squared error; 1/N in epilogue

    if masked:
        # Padded (zero) boxes give 0/0 = NaN in iou/giou -> select them out before accumulating.
        row = jax.lax.broadcasted_iota(jnp.int32, (tile_m, 128), 0)
        lane = jax.lax.broadcasted_iota(jnp.int32, (tile_m, 128), 1)
        gidx = (i * tile_m + row) * 128 + lane              # global box index
        valid = gidx < n
        l1 = jnp.where(valid, l1, 0.0)
        one_m_giou = jnp.where(valid, one_m_giou, 0.0)
        conf_sq = jnp.where(valid, conf_sq, 0.0)

    # ---- pure-VPU accumulation; all cross-sublane / cross-lane reduces deferred to epilogue ----
    acc_bbox[...] += l1
    acc_giou[...] += one_m_giou
    acc_conf[...] += conf_sq

    @pl.when(i == pl.num_programs(0) - 1)
    def _finalize():
        def _total(acc):
            col = jnp.sum(acc[...], axis=0, keepdims=True)   # (1, 128) sublane/M reduce
            return jnp.sum(col, axis=1, keepdims=True)       # (1, 1)   lane reduce (XLU, once)

        b_tot = _total(acc_bbox)
        g_tot = _total(acc_giou)
        c_tot = _total(acc_conf) * (1.0 / n)                 # MSE mean over the LOGICAL N

        # One full, unmasked (8, 128) vreg store: row 0 = bbox, row 1 = giou, row 2 = conf.
        sub = jax.lax.broadcasted_iota(jnp.int32, (8, 128), 0)
        out_ref[...] = (jnp.where(sub == 0, b_tot, 0.0)
                        + jnp.where(sub == 1, g_tot, 0.0)
                        + jnp.where(sub == 2, c_tot, 0.0))


def set_criterion(pred_boxes, pred_conf, targets, *, tile_m=None):
    """pred_boxes: (N, 4) xywh; pred_conf: (N,); targets: anything reshapeable to (N, 4) xywh."""
    n = pred_boxes.shape[0]
    p = jnp.asarray(pred_boxes, jnp.float32).reshape(n, 4)
    t = jnp.asarray(targets, jnp.float32).reshape(n, 4)
    c = jnp.asarray(pred_conf, jnp.float32).reshape(n)

    # --- tiling: rows of 128 boxes, tile_m rows (multiple of 8) per grid step ---
    rows = -(-n // 128)                                      # ceil(n / 128)
    if tile_m is None:
        tile_m = min(256, ((rows + 7) // 8) * 8)             # <=256 rows -> ~1 MiB/input buffer
    tile_m = max(8, ((tile_m + 7) // 8) * 8)
    num_tiles = -(-rows // tile_m)
    m_pad = num_tiles * tile_m
    n_pad = m_pad * 128

    # --- single fused repack pass into coordinate-major dense tiles ---
    boxes = jnp.concatenate([p, t], axis=1)                  # (n, 8): pred xywh | tgt xywh
    boxes = jnp.pad(boxes, ((0, n_pad - n), (0, 0)))         # zero-pad boxes (masked in-kernel)
    boxes = boxes.T.reshape(8, m_pad, 128)                   # (8, m_pad, 128)
    conf = jnp.pad(c, (0, n_pad - n)).reshape(m_pad, 128)    # (m_pad, 128)

    kernel = functools.partial(_criterion_kernel, n=n, tile_m=tile_m, masked=(n != n_pad))

    out = pl.pallas_call(
        kernel,
        out_shape=jax.ShapeDtypeStruct((8, 128), jnp.float32),
        grid=(num_tiles,),
        in_specs=[
            pl.BlockSpec((8, tile_m, 128), lambda i: (0, i, 0)),
            pl.BlockSpec((tile_m, 128), lambda i: (i, 0)),
        ],
        out_specs=pl.BlockSpec((8, 128), lambda i: (0, 0)),
        scratch_shapes=[
            pltpu.VMEM((tile_m, 128), jnp.float32),
            pltpu.VMEM((tile_m, 128), jnp.float32),
            pltpu.VMEM((tile_m, 128), jnp.float32),
        ],
        compiler_params=pltpu.CompilerParams(dimension_semantics=("arbitrary",)),
    )(boxes, conf)

    return {
        "loss_bbox": out[0, 0],
        "loss_giou": out[1, 0],
        "loss_conf": out[2, 0],
    }


def _reference(pred_boxes, pred_conf, targets):
    """Plain-JAX reference mirroring the PyTorch module (for correctness check)."""
    n = pred_boxes.shape[0]
    p = jnp.asarray(pred_boxes, jnp.float32)
    t = jnp.asarray(targets, jnp.float32).reshape(n, 4)
    c = jnp.asarray(pred_conf, jnp.float32).reshape(n)

    def to_cxcywh(b):
        x, y, w, h = b[:, 0], b[:, 1], b[:, 2], b[:, 3]
        return jnp.stack([x + 0.5 * w, y + 0.5 * h, w, h], axis=1)

    def to_xyxy(b):
        x, y, w, h = b[:, 0], b[:, 1], b[:, 2], b[:, 3]
        return jnp.stack([x, y, x + w, y + h], axis=1)

    loss_bbox = jnp.sum(jnp.abs(to_cxcywh(p) - to_cxcywh(t)))

    pb, tb = to_xyxy(p), to_xyxy(t)
    area_p = (pb[:, 2] - pb[:, 0]) * (pb[:, 3] - pb[:, 1])
    area_t = (tb[:, 2] - tb[:, 0]) * (tb[:, 3] - tb[:, 1])
    lt = jnp.maximum(pb[:, :2], tb[:, :2])
    rb = jnp.minimum(pb[:, 2:], tb[:, 2:])
    wh = jnp.clip(rb - lt, 0.0)
    inter = wh[:, 0] * wh[:, 1]
    union = area_p + area_t - inter
    iou = inter / union
    clt = jnp.minimum(pb[:, :2], tb[:, :2])
    crb = jnp.maximum(pb[:, 2:], tb[:, 2:])
    cwh = jnp.clip(crb - clt, 0.0)
    carea = cwh[:, 0] * cwh[:, 1]
    giou = iou - (carea - union) / carea

    loss_giou = jnp.sum(1.0 - giou)
    loss_conf = jnp.mean((c - giou) ** 2)
    return {"loss_bbox": loss_bbox, "loss_giou": loss_giou, "loss_conf": loss_conf}


def _make_inputs(key, n):
    k1, k2, k3, k4, k5 = jax.random.split(key, 5)
    pred_xy = jax.random.uniform(k1, (n, 2), minval=0.0, maxval=0.5)
    pred_wh = jax.random.uniform(k2, (n, 2), minval=0.1, maxval=0.5)
    pred_boxes = jnp.concatenate([pred_xy, pred_wh], axis=1)            # (n, 4) xywh
    tgt_xy = jax.random.uniform(k3, (n, 2), minval=0.0, maxval=0.5)
    tgt_wh = jax.random.uniform(k4, (n, 2), minval=0.1, maxval=0.5)
    targets = jnp.concatenate([tgt_xy, tgt_wh], axis=1)                 # (n, 4) xywh
    pred_conf = jax.random.uniform(k5, (n,), minval=0.0, maxval=1.0)    # (n,)
    return pred_boxes, pred_conf, targets


def _check(key, n, tile_m=None):
    pred_boxes, pred_conf, targets = _make_inputs(key, n)
    losses = set_criterion(pred_boxes, pred_conf, targets, tile_m=tile_m)
    losses = {k: jax.block_until_ready(v) for k, v in losses.items()}
    ref = _reference(pred_boxes, pred_conf, targets)
    for k in ("loss_bbox", "loss_giou", "loss_conf"):
        np.testing.assert_allclose(np.asarray(losses[k]), np.asarray(ref[k]),
                                   rtol=1e-5, atol=1e-5)


if __name__ == "__main__":
    key = jax.random.PRNGKey(0)
    k_small, k_pad, k_multi = jax.random.split(key, 3)

    # primary small-shape run: N = 8 (prediction, target) box pairs
    _check(k_small, 8)
    # N not a multiple of 128: padded lanes must be masked (no NaN leak)
    _check(k_pad, 130)
    # multi-step grid with a tiny tile to exercise init / accumulate / finalize + masking
    _check(k_multi, 2500, tile_m=8)

    print("KERNEL_OK")
</pallas_src>

<mosaic_0001>
module attributes {stable_mosaic.version = 11 : i64} {
  func.func @_criterion_kernel(%arg0: i32, %arg1: memref<8x8x128xf32, #tpu.memory_space<vmem>>, %arg2: memref<8x128xf32, #tpu.memory_space<vmem>>, %arg3: memref<8x128xf32, #tpu.memory_space<vmem>>, %arg4: memref<8x128xf32, #tpu.memory_space<vmem>>, %arg5: memref<8x128xf32, #tpu.memory_space<vmem>>, %arg6: memref<8x128xf32, #tpu.memory_space<vmem>>) attributes {dimension_semantics = [#tpu.dimension_semantics<arbitrary>], iteration_bounds = array<i64: 1>, scalar_prefetch = 0 : i64, scratch_operands = 3 : i64, tpu.core_type = #tpu.core_type<tc>, window_params = [{transform_indices = @transform_0, window_bounds = array<i64: 8, 8, 128>}, {transform_indices = @transform_1, window_bounds = array<i64: 8, 128>}, {pipeline_mode = #tpu.pipeline_mode<synchronous>, transform_indices = @transform_2, window_bounds = array<i64: 8, 128>}]} {
    %c0_i32 = arith.constant 0 : i32
    %0 = arith.cmpi eq, %arg0, %c0_i32 : i32
    %1 = arith.extui %0 : i1 to i32
    %c0_i32_0 = arith.constant 0 : i32
    %2 = arith.cmpi ne, %1, %c0_i32_0 : i32
    scf.if %2 {
      %cst_43 = arith.constant 0.000000e+00 : f32
      %103 = vector.broadcast %cst_43 : f32 to vector<8x128xf32>
      %c0_44 = arith.constant 0 : index
      %c0_45 = arith.constant 0 : index
      %104 = vector.load %arg4[%c0_44, %c0_45] : memref<8x128xf32, #tpu.memory_space<vmem>>, vector<8x128xf32>
      tpu.vector_store %arg4[%c0_44, %c0_45], %103 {strides = array<i32>} : memref<8x128xf32, #tpu.memory_space<vmem>>, vector<8x128xf32>,
      %cst_46 = arith.constant 0.000000e+00 : f32
      %105 = vector.broadcast %cst_46 : f32 to vector<8x128xf32>
      %c0_47 = arith.constant 0 : index
      %c0_48 = arith.constant 0 : index
      %106 = vector.load %arg5[%c0_47, %c0_48] : memref<8x128xf32, #tpu.memory_space<vmem>>, vector<8x128xf32>
      tpu.vector_store %arg5[%c0_47, %c0_48], %105 {strides = array<i32>} : memref<8x128xf32, #tpu.memory_space<vmem>>, vector<8x128xf32>,
      %cst_49 = arith.constant 0.000000e+00 : f32
      %107 = vector.broadcast %cst_49 : f32 to vector<8x128xf32>
      %c0_50 = arith.constant 0 : index
      %c0_51 = arith.constant 0 : index
      %108 = vector.load %arg6[%c0_50, %c0_51] : memref<8x128xf32, #tpu.memory_space<vmem>>, vector<8x128xf32>
      tpu.vector_store %arg6[%c0_50, %c0_51], %107 {strides = array<i32>} : memref<8x128xf32, #tpu.memory_space<vmem>>, vector<8x128xf32>,
    } else {
    }
    %c0 = arith.constant 0 : index
    %c0_1 = arith.constant 0 : index
    %c0_2 = arith.constant 0 : index
    %3 = vector.load %arg1[%c0, %c0_1, %c0_2] : memref<8x8x128xf32, #tpu.memory_space<vmem>>, vector<1x8x128xf32>
    %4 = vector.shape_cast %3 : vector<1x8x128xf32> to vector<8x128xf32>
    %c1 = arith.constant 1 : index
    %c0_3 = arith.constant 0 : index
    %c0_4 = arith.constant 0 : index
    %5 = vector.load %arg1[%c1, %c0_3, %c0_4] : memref<8x8x128xf32, #tpu.memory_space<vmem>>, vector<1x8x128xf32>
    %6 = vector.shape_cast %5 : vector<1x8x128xf32> to vector<8x128xf32>
    %c2 = arith.constant 2 : index
    %c0_5 = arith.constant 0 : index
    %c0_6 = arith.constant 0 : index
    %7 = vector.load %arg1[%c2, %c0_5, %c0_6] : memref<8x8x128xf32, #tpu.memory_space<vmem>>, vector<1x8x128xf32>
    %8 = vector.shape_cast %7 : vector<1x8x128xf32> to vector<8x128xf32>
    %c3 = arith.constant 3 : index
    %c0_7 = arith.constant 0 : index
    %c0_8 = arith.constant 0 : index
    %9 = vector.load %arg1[%c3, %c0_7, %c0_8] : memref<8x8x128xf32, #tpu.memory_space<vmem>>, vector<1x8x128xf32>
    %10 = vector.shape_cast %9 : vector<1x8x128xf32> to vector<8x128xf32>
    %c4 = arith.constant 4 : index
    %c0_9 = arith.constant 0 : index
    %c0_10 = arith.constant 0 : index
    %11 = vector.load %arg1[%c4, %c0_9, %c0_10] : memref<8x8x128xf32, #tpu.memory_space<vmem>>, vector<1x8x128xf32>
    %12 = vector.shape_cast %11 : vector<1x8x128xf32> to vector<8x128xf32>
    %c5 = arith.constant 5 : index
    %c0_11 = arith.constant 0 : index
    %c0_12 = arith.constant 0 : index
    %13 = vector.load %arg1[%c5, %c0_11, %c0_12] : memref<8x8x128xf32, #tpu.memory_space<vmem>>, vector<1x8x128xf32>
    %14 = vector.shape_cast %13 : vector<1x8x128xf32> to vector<8x128xf32>
    %c6 = arith.constant 6 : index
    %c0_13 = arith.constant 0 : index
    %c0_14 = arith.constant 0 : index
    %15 = vector.load %arg1[%c6, %c0_13, %c0_14] : memref<8x8x128xf32, #tpu.memory_space<vmem>>, vector<1x8x128xf32>
    %16 = vector.shape_cast %15 : vector<1x8x128xf32> to vector<8x128xf32>
    %c7 = arith.constant 7 : index
    %c0_15 = arith.constant 0 : index
    %c0_16 = arith.constant 0 : index
    %17 = vector.load %arg1[%c7, %c0_15, %c0_16] : memref<8x8x128xf32, #tpu.memory_space<vmem>>, vector<1x8x128xf32>
    %18 = vector.shape_cast %17 : vector<1x8x128xf32> to vector<8x128xf32>
    %19 = arith.subf %4, %12 : vector<8x128xf32>
    %20 = arith.subf %6, %14 : vector<8x128xf32>
    %21 = arith.subf %8, %16 : vector<8x128xf32>
    %22 = arith.subf %10, %18 : vector<8x128xf32>
    %cst = arith.constant 5.000000e-01 : f32
    %23 = vector.broadcast %cst : f32 to vector<8x128xf32>
    %24 = arith.mulf %23, %21 : vector<8x128xf32>
    %25 = arith.addf %19, %24 : vector<8x128xf32>
    %26 = math.absf %25 : vector<8x128xf32>
    %cst_17 = arith.constant 5.000000e-01 : f32
    %27 = vector.broadcast %cst_17 : f32 to vector<8x128xf32>
    %28 = arith.mulf %27, %22 : vector<8x128xf32>
    %29 = arith.addf %20, %28 : vector<8x128xf32>
    %30 = math.absf %29 : vector<8x128xf32>
    %31 = arith.addf %26, %30 : vector<8x128xf32>
    %32 = math.absf %21 : vector<8x128xf32>
    %33 = arith.addf %31, %32 : vector<8x128xf32>
    %34 = math.absf %22 : vector<8x128xf32>
    %35 = arith.addf %33, %34 : vector<8x128xf32>
    %36 = arith.addf %4, %8 : vector<8x128xf32>
    %37 = arith.addf %6, %10 : vector<8x128xf32>
    %38 = arith.addf %12, %16 : vector<8x128xf32>
    %39 = arith.addf %14, %18 : vector<8x128xf32>
    %40 = arith.minimumf %36, %38 : vector<8x128xf32>
    %41 = arith.maximumf %4, %12 : vector<8x128xf32>
    %42 = arith.subf %40, %41 : vector<8x128xf32>
    %cst_18 = arith.constant 0.000000e+00 : f32
    %43 = vector.broadcast %cst_18 : f32 to vector<8x128xf32>
    %44 = arith.maximumf %42, %43 : vector<8x128xf32>
    %45 = arith.minimumf %37, %39 : vector<8x128xf32>
    %46 = arith.maximumf %6, %14 : vector<8x128xf32>
    %47 = arith.subf %45, %46 : vector<8x128xf32>
    %cst_19 = arith.constant 0.000000e+00 : f32
    %48 = vector.broadcast %cst_19 : f32 to vector<8x128xf32>
    %49 = arith.maximumf %47, %48 : vector<8x128xf32>
    %50 = arith.mulf %44, %49 : vector<8x128xf32>
    %51 = arith.mulf %8, %10 : vector<8x128xf32>
    %52 = arith.mulf %16, %18 : vector<8x128xf32>
    %53 = arith.addf %51, %52 : vector<8x128xf32>
    %54 = arith.subf %53, %50 : vector<8x128xf32>
    %55 = arith.divf %50, %54 : vector<8x128xf32>
    %56 = arith.maximumf %36, %38 : vector<8x128xf32>
    %57 = arith.minimumf %4, %12 : vector<8x128xf32>
    %58 = arith.subf %56, %57 : vector<8x128xf32>
    %cst_20 = arith.constant 0.000000e+00 : f32
    %59 = vector.broadcast %cst_20 : f32 to vector<8x128xf32>
    %60 = arith.maximumf %58, %59 : vector<8x128xf32>
    %61 = arith.maximumf %37, %39 : vector<8x128xf32>
    %62 = arith.minimumf %6, %14 : vector<8x128xf32>
    %63 = arith.subf %61, %62 : vector<8x128xf32>
    %cst_21 = arith.constant 0.000000e+00 : f32
    %64 = vector.broadcast %cst_21 : f32 to vector<8x128xf32>
    %65 = arith.maximumf %63, %64 : vector<8x128xf32>
    %66 = arith.mulf %60, %65 : vector<8x128xf32>
    %67 = arith.subf %66, %54 : vector<8x128xf32>
    %68 = arith.divf %67, %66 : vector<8x128xf32>
    %69 = arith.subf %55, %68 : vector<8x128xf32>
    %cst_22 = arith.constant 1.000000e+00 : f32
    %70 = vector.broadcast %cst_22 : f32 to vector<8x128xf32>
    %71 = arith.subf %70, %69 : vector<8x128xf32>
    %c0_23 = arith.constant 0 : index
    %c0_24 = arith.constant 0 : index
    %72 = vector.load %arg2[%c0_23, %c0_24] : memref<8x128xf32, #tpu.memory_space<vmem>>, vector<8x128xf32>
    %73 = arith.subf %72, %69 : vector<8x128xf32>
    %74 = arith.mulf %73, %73 : vector<8x128xf32>
    %75 = tpu.iota {dimensions = array<i32: 0>} : vector<8x128xi32>
    %76 = tpu.iota {dimensions = array<i32: 1>} : vector<8x128xi32>
    %c8_i32 = arith.constant 8 : i32
    %77 = arith.muli %arg0, %c8_i32 : i32
    %78 = vector.broadcast %77 : i32 to vector<8x128xi32>
    %79 = arith.addi %78, %75 : vector<8x128xi32>
    %c128_i32 = arith.constant 128 : i32
    %80 = vector.broadcast %c128_i32 : i32 to vector<8x128xi32>
    %81 = arith.muli %79, %80 : vector<8x128xi32>
    %82 = arith.addi %81, %76 : vector<8x128xi32>
    %c8_i32_25 = arith.constant 8 : i32
    %83 = vector.broadcast %c8_i32_25 : i32 to vector<8x128xi32>
    %84 = arith.cmpi slt, %82, %83 : vector<8x128xi32>
    %cst_26 = arith.constant 0.000000e+00 : f32
    %85 = vector.broadcast %cst_26 : f32 to vector<8x128xf32>
    %86 = arith.select %84, %35, %85 : vector<8x128xi1>, vector<8x128xf32>
    %cst_27 = arith.constant 0.000000e+00 : f32
    %87 = vector.broadcast %cst_27 : f32 to vector<8x128xf32>
    %88 = arith.select %84, %71, %87 : vector<8x128xi1>, vector<8x128xf32>
    %cst_28 = arith.constant 0.000000e+00 : f32
    %89 = vector.broadcast %cst_28 : f32 to vector<8x128xf32>
    %90 = arith.select %84, %74, %89 : vector<8x128xi1>, vector<8x128xf32>
    %c0_29 = arith.constant 0 : index
    %c0_30 = arith.constant 0 : index
    %91 = vector.load %arg4[%c0_29, %c0_30] : memref<8x128xf32, #tpu.memory_space<vmem>>, vector<8x128xf32>
    %92 = arith.addf %91, %86 : vector<8x128xf32>
    %c0_31 = arith.constant 0 : index
    %c0_32 = arith.constant 0 : index
    %93 = vector.load %arg4[%c0_31, %c0_32] : memref<8x128xf32, #tpu.memory_space<vmem>>, vector<8x128xf32>
    tpu.vector_store %arg4[%c0_31, %c0_32], %92 {strides = array<i32>} : memref<8x128xf32, #tpu.memory_space<vmem>>, vector<8x128xf32>,
    %c0_33 = arith.constant 0 : index
    %c0_34 = arith.constant 0 : index
    %94 = vector.load %arg5[%c0_33, %c0_34] : memref<8x128xf32, #tpu.memory_space<vmem>>, vector<8x128xf32>
    %95 = arith.addf %94, %88 : vector<8x128xf32>
    %c0_35 = arith.constant 0 : index
    %c0_36 = arith.constant 0 : index
    %96 = vector.load %arg5[%c0_35, %c0_36] : memref<8x128xf32, #tpu.memory_space<vmem>>, vector<8x128xf32>
    tpu.vector_store %arg5[%c0_35, %c0_36], %95 {strides = array<i32>} : memref<8x128xf32, #tpu.memory_space<vmem>>, vector<8x128xf32>,
    %c0_37 = arith.constant 0 : index
    %c0_38 = arith.constant 0 : index
    %97 = vector.load %arg6[%c0_37, %c0_38] : memref<8x128xf32, #tpu.memory_space<vmem>>, vector<8x128xf32>
    %98 = arith.addf %97, %90 : vector<8x128xf32>
    %c0_39 = arith.constant 0 : index
    %c0_40 = arith.constant 0 : index
    %99 = vector.load %arg6[%c0_39, %c0_40] : memref<8x128xf32, #tpu.memory_space<vmem>>, vector<8x128xf32>
    tpu.vector_store %arg6[%c0_39, %c0_40], %98 {strides = array<i32>} : memref<8x128xf32, #tpu.memory_space<vmem>>, vector<8x128xf32>,
    %c0_i32_41 = arith.constant 0 : i32
    %100 = arith.cmpi eq, %arg0, %c0_i32_41 : i32
    %101 = arith.extui %100 : i1 to i32
    %c0_i32_42 = arith.constant 0 : i32
    %102 = arith.cmpi ne, %101, %c0_i32_42 : i32
    scf.if %102 {
      %c0_43 = arith.constant 0 : index
      %c0_44 = arith.constant 0 : index
      %103 = vector.load %arg4[%c0_43, %c0_44] : memref<8x128xf32, #tpu.memory_space<vmem>>, vector<8x128xf32>
      %cst_45 = arith.constant dense<0.000000e+00> : vector<128xf32>
      %104 = vector.multi_reduction <add>, %103, %cst_45 [0] : vector<8x128xf32> to vector<128xf32>
      %105 = vector.shape_cast %104 : vector<128xf32> to vector<1x128xf32>
      %cst_46 = arith.constant dense<0.000000e+00> : vector<1xf32>
      %106 = vector.multi_reduction <add>, %105, %cst_46 [1] : vector<1x128xf32> to vector<1xf32>
      %107 = vector.shape_cast %106 : vector<1xf32> to vector<1x1xf32>
      %c0_47 = arith.constant 0 : index
      %c0_48 = arith.constant 0 : index
      %108 = vector.load %arg5[%c0_47, %c0_48] : memref<8x128xf32, #tpu.memory_space<vmem>>, vector<8x128xf32>
      %cst_49 = arith.constant dense<0.000000e+00> : vector<128xf32>
      %109 = vector.multi_reduction <add>, %108, %cst_49 [0] : vector<8x128xf32> to vector<128xf32>
      %110 = vector.shape_cast %109 : vector<128xf32> to vector<1x128xf32>
      %cst_50 = arith.constant dense<0.000000e+00> : vector<1xf32>
      %111 = vector.multi_reduction <add>, %110, %cst_50 [1] : vector<1x128xf32> to vector<1xf32>
      %112 = vector.shape_cast %111 : vector<1xf32> to vector<1x1xf32>
      %c0_51 = arith.constant 0 : index
      %c0_52 = arith.constant 0 : index
      %113 = vector.load %arg6[%c0_51, %c0_52] : memref<8x128xf32, #tpu.memory_space<vmem>>, vector<8x128xf32>
      %cst_53 = arith.constant dense<0.000000e+00> : vector<128xf32>
      %114 = vector.multi_reduction <add>, %113, %cst_53 [0] : vector<8x128xf32> to vector<128xf32>
      %115 = vector.shape_cast %114 : vector<128xf32> to vector<1x128xf32>
      %cst_54 = arith.constant dense<0.000000e+00> : vector<1xf32>
      %116 = vector.multi_reduction <add>, %115, %cst_54 [1] : vector<1x128xf32> to vector<1xf32>
      %117 = vector.shape_cast %116 : vector<1xf32> to vector<1x1xf32>
      %cst_55 = arith.constant 1.250000e-01 : f32
      %118 = vector.broadcast %cst_55 : f32 to vector<1x1xf32>
      %119 = arith.mulf %117, %118 : vector<1x1xf32>
      %120 = tpu.iota {dimensions = array<i32: 0>} : vector<8x128xi32>
      %c0_i32_56 = arith.constant 0 : i32
      %121 = vector.broadcast %c0_i32_56 : i32 to vector<8x128xi32>
      %122 = arith.cmpi eq, %120, %121 : vector<8x128xi32>
      %cst_57 = arith.constant 0.000000e+00 : f32
      %123 = vector.shape_cast %107 : vector<1x1xf32> to vector<1x1xf32>
      %124 = vector.broadcast %123 : vector<1x1xf32> to vector<8x128xf32>
      %125 = vector.broadcast %cst_57 : f32 to vector<8x128xf32>
      %126 = arith.select %122, %124, %125 : vector<8x128xi1>, vector<8x128xf32>
      %c1_i32 = arith.constant 1 : i32
      %127 = vector.broadcast %c1_i32 : i32 to vector<8x128xi32>
      %128 = arith.cmpi eq, %120, %127 : vector<8x128xi32>
      %cst_58 = arith.constant 0.000000e+00 : f32
      %129 = vector.shape_cast %112 : vector<1x1xf32> to vector<1x1xf32>
      %130 = vector.broadcast %129 : vector<1x1xf32> to vector<8x128xf32>
      %131 = vector.broadcast %cst_58 : f32 to vector<8x128xf32>
      %132 = arith.select %128, %130, %131 : vector<8x128xi1>, vector<8x128xf32>
      %133 = arith.addf %126, %132 : vector<8x128xf32>
      %c2_i32 = arith.constant 2 : i32
      %134 = vector.broadcast %c2_i32 : i32 to vector<8x128xi32>
      %135 = arith.cmpi eq, %120, %134 : vector<8x128xi32>
      %cst_59 = arith.constant 0.000000e+00 : f32
      %136 = vector.shape_cast %119 : vector<1x1xf32> to vector<1x1xf32>
      %137 = vector.broadcast %136 : vector<1x1xf32> to vector<8x128xf32>
      %138 = vector.broadcast %cst_59 : f32 to vector<8x128xf32>
      %139 = arith.select %135, %137, %138 : vector<8x128xi1>, vector<8x128xf32>
      %140 = arith.addf %133, %139 : vector<8x128xf32>
      %c0_60 = arith.constant 0 : index
      %c0_61 = arith.constant 0 : index
      %141 = vector.load %arg3[%c0_60, %c0_61] : memref<8x128xf32, #tpu.memory_space<vmem>>, vector<8x128xf32>
      tpu.vector_store %arg3[%c0_60, %c0_61], %140 {strides = array<i32>} : memref<8x128xf32, #tpu.memory_space<vmem>>, vector<8x128xf32>,
    } else {
    }
    return
  }
  func.func @transform_0(%arg0: i32) -> (i32, i32, i32) {
    %c0_i32 = arith.constant 0 : i32
    %c0_i32_0 = arith.constant 0 : i32
    %c0_i32_1 = arith.constant 0 : i32
    return %c0_i32, %arg0, %c0_i32_0 : i32, i32, i32
  }
  func.func @transform_1(%arg0: i32) -> (i32, i32) {
    %c0_i32 = arith.constant 0 : i32
    %c0_i32_0 = arith.constant 0 : i32
    return %arg0, %c0_i32 : i32, i32
  }
  func.func @transform_2(%arg0: i32) -> (i32, i32) {
    %c0_i32 = arith.constant 0 : i32
    %c0_i32_0 = arith.constant 0 : i32
    %c0_i32_1 = arith.constant 0 : i32
    return %c0_i32, %c0_i32_0 : i32, i32
  }
}

</mosaic_0001>

<bundles_post_ra>
// kernel: tpu_custom_call.1
= control target key start
LH: loop header
LB: loop body
LE: loop exit
PB: predicated region body
PF: predicated region fallthrough
CT: control target
= control target key end

     0   :  { %7 = vsyncpa [#allocation6], 0  ;;  %s346_s0 = inlined_call_operand.hbm [shape: f32[8,8,128], index: 0, kind: input, shape index: {}]   ;;  %s347_s1 = inlined_call_operand.hbm [shape: f32[8,128], index: 1, kind: input, shape index: {}]   ;;  %s348_s2 = inlined_call_operand.hbm [shape: f32[8,128], index: 2, kind: output, shape index: {}]  }
   0x1   :  { %8 = vsyncpa [#allocation9], 0 }
   0x2   :  { %9 = vsyncpa [#allocation7], 0  ;;  %s14_s11 = sshll.u32 %s346_s0, 4  ;;  %s308_s12 = smov [#allocation5]   ;;  %s15_s11 = int_to_ptr.hbm [resolvable:$true] %s14_s11 }
   0x3   :  { %s16_s13 = sshll.u32 %s308_s12, 4  ;;  %s28_s16 = sshll.u32 %s347_s1, 4  ;;  %s17_s13 = int_to_ptr.vmem [resolvable:$true] %s16_s13  ;;  %s29_s16 = int_to_ptr.hbm [resolvable:$true] %s28_s16 }
   0x4   :  { %s309_s17 = smov 128   ;;  %s310_s18 = smov 8  }
   0x5   :  { %22 = dma.hbm_to_vmem [thread:$0]  %s15_s11, 1024, %s17_s13, [#allocation6], %s309_s17, %s309_s17, %s310_s18  }
   0x6   :  { %s311_s19 = smov [#allocation8]  }
   0x7   :  { %s30_s20 = sshll.u32 %s311_s19, 4  ;;  %s31_s20 = int_to_ptr.vmem [resolvable:$true] %s30_s20 }
   0x8   :  { %33 = dma.hbm_to_vmem [thread:$0]  %s29_s16, 128, %s31_s20, [#allocation9]  }
   0x9   :  { %302 = dma.done.wait [#allocation6], 1024  }
   0xa   :  { %303 = vsyncadd [#allocation6], 4294966272 }
   0xb   :  { %304 = dma.done.wait [#allocation9], 128  }
   0xc   :  { %305 = vsyncadd [#allocation9], 4294967168  ;;  %v141_v0 = vlaneseq  ;;  %v49_v1 = vld [vmem:[#allocation5] sm:$0xff]  ;;  %v51_v2 = vld [vmem:[#allocation5 + $0x8] sm:$0xff]  ;;  %s312_s0 = smov [#allocation10]   ;;  %s210_s23 = sshll.u32 %s348_s2, 4  ;;  %s211_s23 = int_to_ptr.hbm [resolvable:$true] %s210_s23 }
   0xd   :  { %v53_v3 = vld [vmem:[#allocation5 + $0x10] sm:$0xff]  ;;  %v55_v5 = vld [vmem:[#allocation5 + $0x18] sm:$0xff]  ;;  %v57_v6 = vld [vmem:[#allocation5 + $0x20] sm:$0xff]  ;;  %s208_s1 = sshll.u32 %s312_s0, 4  ;;  %s209_s1 = int_to_ptr.vmem [resolvable:$true] %s208_s1 }
   0xe   :  { %v334_v4 = vshrl.u32 %v141_v0, 7  ;;  %v59_v7 = vld [vmem:[#allocation5 + $0x28] sm:$0xff]  ;;  %v61_v8 = vld [vmem:[#allocation5 + $0x30] sm:$0xff]  ;;  %v63_v9 = vld [vmem:[#allocation5 + $0x38] sm:$0xff]  ;;  %v64_v10 = vsub.f32 %v49_v1, %v57_v6  ;;  %v79_v12 = vadd.f32 %v53_v3, %v49_v1  ;;  %v80_v13 = vadd.f32 %v55_v5, %v51_v2 }
   0xf   :  { %v65_v11 = vsub.f32 %v51_v2, %v59_v7  ;;  %v66_v14 = vsub.f32 %v53_v3, %v61_v8  ;;  %v67_v15 = vsub.f32 %v55_v5, %v63_v9  ;;  %v81_v16 = vadd.f32 %v61_v8, %v57_v6 }
  0x10   :  { %v82_v17 = vadd.f32 %v63_v9, %v59_v7  ;;  %v112_v18 = vmin.f32 %v49_v1, %v57_v6  ;;  %v116_v19 = vmin.f32 %v51_v2, %v59_v7  ;;  %v144_v20 = vand.u32 127, %v141_v0 }
  0x11   :  { %v148_v21 = vmul.u32 128, %v334_v4  ;;  %v68_v22 = vmul.f32 0.5, %v66_v14  ;;  %v71_v23 = vmul.f32 0.5, %v67_v15  ;;  %v92_v24 = vmul.f32 %v55_v5, %v53_v3 }
  0x12   :  { %v84_v25 = vmax.f32 %v49_v1, %v57_v6  ;;  %v87_v26 = vmin.f32 %v80_v13, %v82_v17  ;;  %v93_v27 = vmul.f32 %v63_v9, %v61_v8  ;;  %v111_v28 = vmax.f32 %v79_v12, %v81_v16 }
  0x13   :  { %v115_v29 = vmax.f32 %v80_v13, %v82_v17  ;;  %v69_v30 = vadd.f32 %v68_v22, %v64_v10  ;;  %v72_v31 = vadd.f32 %v71_v23, %v65_v11  ;;  %v83_v32 = vmin.f32 %v79_v12, %v81_v16 }
  0x14   :  { %v88_v33 = vmax.f32 %v51_v2, %v59_v7  ;;  %v75_v34 = vand.u32 2147483647, %v66_v14  ;;  %v113_v35 = vsub.f32 %v111_v28, %v112_v18  ;;  %v77_v41 = vand.u32 2147483647, %v67_v15 }
  0x15   :  { %v117_v36 = vsub.f32 %v115_v29, %v116_v19  ;;  %v70_v37 = vand.u32 2147483647, %v69_v30  ;;  %v73_v38 = vand.u32 2147483647, %v72_v31  ;;  %v85_v39 = vsub.f32 %v83_v32, %v84_v25 }
  0x16   :  { %v89_v40 = vsub.f32 %v87_v26, %v88_v33  ;;  %v114_v42 = vmax.f32 %v113_v35, 0.0  ;;  %v149_v44 = vadd.s32 %v148_v21, %v144_v20  ;;  %v94_v46 = vadd.f32 %v93_v27, %v92_v24  ;;  %v138_v21 = vld [vmem:[#allocation8] sm:$0xff] }
  0x17   :  { %v118_v43 = vmax.f32 %v117_v36, 0.0  ;;  %v74_v45 = vadd.f32 %v73_v38, %v70_v37  ;;  %v86_v47 = vmax.f32 %v85_v39, 0.0  ;;  %vm196_vm9 = vcmp.eq.s32.totalorder %v334_v4, 1 }
  0x18   :  { %v90_v48 = vmax.f32 %v89_v40, 0.0  ;;  %vm150_vm0 = vcmp.lt.s32.totalorder %v149_v44, 8  ;;  %vm194_vm10 = vcmp.eq.s32.totalorder %v334_v4, 0  ;;  %vm199_vm11 = vcmp.eq.s32.totalorder %v334_v4, 2 }
  0x19   :  { %v119_v49 = vmul.f32 %v118_v43, %v114_v42  ;;  %v76_v50 = vadd.f32 %v75_v34, %v74_v45 }
  0x1a   :  { %v91_v51 = vmul.f32 %v90_v48, %v86_v47 }
  0x1b   :  { %226 = vrcp.f32 %v119_v49  ;;  %v78_v52 = vadd.f32 %v77_v41, %v76_v50  ;;  %v132_v59 = vand.u32 2147483648, %v119_v49  ;;  %vm126_vm1 = vweird.f32 %v119_v49 }
  0x1c   :  { %v95_v53 = vsub.f32 %v94_v46, %v91_v51  ;;  %v130_v63 = vand.u32 2147483647, %v119_v49 }
  0x1d   :  { %v151_v54 = vsel %vm150_vm0, %v78_v52, 0.0  ;;  %v133_v5 = vor.u32 1.1754944e-38, %v132_v59 }
  0x1e   :  { %228 = vrcp.f32 %v95_v53  ;;  %v167_v55 = vrot.slane %v151_v54, 4  ;;  %vm101_vm3 = vweird.f32 %v95_v53  ;;  %v107_v2 = vand.u32 2147483648, %v95_v53 }
  0x1f   :  { %v105_v8 = vand.u32 2147483647, %v95_v53  ;;  %vm131_vm6 = vcmp.eq.f32.partialorder %v130_v63, 8.507059e+37  ;;  %v120_v12 = vsub.f32 %v119_v49, %v95_v53 }
  0x20   :  { %v168_v57 = vadd.f32 %v167_v55, %v151_v54  ;;  %v108_v13 = vor.u32 1.1754944e-38, %v107_v2 }
  0x21   :  { %v227_v56 = vpop.eup %226  ;;  %vm106_vm8 = vcmp.eq.f32.partialorder %v105_v8, 8.507059e+37 }
  0x22   :  { %v122_v58 = vmul.f32 %v227_v56, %v119_v49  ;;  %v169_v60 = vrot.slane %v168_v57, 2  ;;  %vm127_vm2 = vweird.f32 %v227_v56 }
  0x23   :  { %vm128_vm5 = vmor %vm126_vm1, %vm127_vm2 }
  0x24   :  { %v229_v61 = vpop.eup %228  ;;  %v123_v62 = vsub.f32 1.0, %v122_v58  ;;  %v170_v0 = vadd.f32 %v169_v60, %v168_v57 }
  0x25   :  { %v97_v1 = vmul.f32 %v229_v61, %v95_v53  ;;  %vm102_vm4 = vweird.f32 %v229_v61 }
  0x26   :  { %v124_v3 = vmul.f32 %v227_v56, %v123_v62  ;;  %v171_v6 = vrot.slane %v170_v0, 1  ;;  %vm103_vm7 = vmor %vm101_vm3, %vm102_vm4 }
  0x27   :  { %v98_v7 = vsub.f32 1.0, %v97_v1 }
  0x28   :  { %v125_v9 = vadd.f32 %v227_v56, %v124_v3  ;;  %v172_v10 = vadd.f32 %v171_v6, %v170_v0 }
  0x29   :  { %v99_v11 = vmul.f32 %v229_v61, %v98_v7 }
  0x2a   :  { %v129_v14 = vsel %vm128_vm5, %v227_v56, %v125_v9  ;;  %173 = vadd.xlane.f32.xlu0 %v172_v10 }
  0x2b   :  { %v100_v15 = vadd.f32 %v229_v61, %v99_v11  ;;  %v134_v16 = vsel %vm131_vm6, %v133_v5, %v129_v14 }
  0x2c   :  { %v135_v18 = vmul.f32 %v134_v16, %v120_v12 }
  0x2d   :  { %v104_v17 = vsel %vm103_vm7, %v229_v61, %v100_v15 }
  0x2e   :  { %v109_v19 = vsel %vm106_vm8, %v108_v13, %v104_v17 }
  0x2f   :  { %v110_v20 = vmul.f32 %v109_v19, %v91_v51 }
  0x31   :  { %v136_v22 = vsub.f32 %v110_v20, %v135_v18 }
  0x33   :  { %v137_v23 = vsub.f32 1.0, %v136_v22  ;;  %v139_v24 = vsub.f32 %v138_v21, %v136_v22 }
  0x35   :  { %v152_v25 = vsel %vm150_vm0, %v137_v23, 0.0  ;;  %v140_v26 = vmul.f32 %v139_v24, %v139_v24 }
  0x36   :  { %v176_v27 = vrot.slane %v152_v25, 4 }
  0x37   :  { %v153_v28 = vsel %vm150_vm0, %v140_v26, 0.0 }
  0x38   :  { %v177_v29 = vadd.f32 %v176_v27, %v152_v25  ;;  %v185_v30 = vrot.slane %v153_v28, 4 }
  0x3a   :  { %v178_v31 = vrot.slane %v177_v29, 2  ;;  %v186_v32 = vadd.f32 %v185_v30, %v153_v28 }
  0x3c   :  { %v179_v33 = vadd.f32 %v178_v31, %v177_v29  ;;  %v187_v34 = vrot.slane %v186_v32, 2 }
  0x3e   :  { %v180_v35 = vrot.slane %v179_v33, 1  ;;  %v188_v36 = vadd.f32 %v187_v34, %v186_v32 }
  0x40   :  { %v181_v37 = vadd.f32 %v180_v35, %v179_v33  ;;  %v189_v38 = vrot.slane %v188_v36, 1 }
  0x42   :  { %182 = vadd.xlane.f32.xlu0 %v181_v37  ;;  %v190_v39 = vadd.f32 %v189_v38, %v188_v36 }
  0x44   :  { %191 = vadd.xlane.f32.xlu1 %v190_v39 }
  0x9d   :  { %v174_v40 = vpop.xlane.xlu0 %173 }
  0x9e   :  { %v195_v44 = vsel %vm194_vm10, %v174_v40, 0.0 }
  0xb5   :  { %v183_v41 = vpop.xlane.xlu0 %182 }
  0xb6   :  { %v197_v42 = vsel %vm196_vm9, %v183_v41, 0.0 }
  0xb7   :  { %v192_v43 = vpop.xlane.xlu1 %191  ;;  %v198_v46 = vadd.f32 %v197_v42, %v195_v44 }
  0xb8   :  { %v193_v45 = vmul.f32 0.125, %v192_v43 }
  0xba   :  { %v200_v47 = vsel %vm199_vm11, %v193_v45, 0.0 }
  0xbb   :  { %v201_v48 = vadd.f32 %v200_v47, %v198_v46 }
  0xbd   :  { %202 = vst [vmem:[#allocation10] sm:$0xff] %v201_v48 }
  0xbe   :  { %213 = dma.vmem_to_hbm [thread:$0]  %s209_s1, 128, %s211_s23, [#allocation7]  }
  0xbf   :  { %306 = dma.done.wait [#allocation7], 128  }
  0xc0   :  { %307 = vsyncadd [#allocation7], 4294967168 }
  0xc1   :  { %218 = vsyncpa [#allocation6], 1 }
  0xc2   :  { %219 = vsyncpa [#allocation9], 1 }
  0xc3   :  { %220 = vsyncpa [#allocation7], 1 }

</bundles_post_ra>
